<compile_context>
chip_gen: v7x
topology: tpu7x:2x2x1
jax: 0.10.0
libtpu: 0.0.40
codegen_flags: <defaults>
</compile_context>

<pallas_src>
import functools
import math

import jax
import jax.numpy as jnp
from jax.experimental import pallas as pl
from jax.experimental.pallas import tpu as pltpu


# ----------------------------------------------------------------------------
# Native-layout kernel: x block is (C, T); reduce over the (non-minor) C axis.
# ----------------------------------------------------------------------------
def _ln_bchw_kernel(*refs, eps, inv_c, with_bias):
    if with_bias:
        x_ref, w_ref, b_ref, o_ref = refs
    else:
        x_ref, w_ref, o_ref = refs
        b_ref = None
    x = x_ref[...].astype(jnp.float32)                    # (C, T)
    mu = jnp.sum(x, axis=0, keepdims=True) * inv_c        # (1, T)
    d = x - mu
    var = jnp.sum(d * d, axis=0, keepdims=True) * inv_c   # (1, T)
    inv = jax.lax.rsqrt(var + eps)                        # (1, T)
    w = w_ref[...]                                        # (C, 1) f32
    numer = d if with_bias else x                         # BiasFree: x / sqrt(var+eps)
    y = (numer * inv) * w                                 # lane + sublane broadcasts
    if with_bias:
        y = y + b_ref[...]
    o_ref[...] = y.astype(o_ref.dtype)


def layernorm_bchw(x, weight, bias=None, *, with_bias=True, eps=1e-5,
                   target_block_bytes=2 << 20, vmem_limit_bytes=48 << 20):
    """MaskHDR LayerNorm: to_3d -> (WithBias|BiasFree)_LayerNorm -> to_4d.

    x: (B, C, H, W).  Computed directly on the native layout (no transposes)."""
    B, C, H, Wd = x.shape
    HW = H * Wd
    x3 = x.reshape(B, C, HW)                              # free, contiguous view
    itemsize = jnp.dtype(x.dtype).itemsize

    w2 = weight.astype(jnp.float32).reshape(C, 1)
    args = [x3, w2]
    if with_bias:
        b_arr = bias if bias is not None else jnp.zeros((C,), jnp.float32)
        args.append(b_arr.astype(jnp.float32).reshape(C, 1))

    # Pick the HW tile: lane-dense (multiple of 128), ~target_block_bytes of
    # HBM-side data per block, but never collapse the grid to <4 total steps
    # (megacore sharding on v7x + DMA/compute overlap need multiple steps).
    if HW <= 128:
        thw = HW
    else:
        thw = max(128, (target_block_bytes // max(1, C * itemsize)) // 128 * 128)
        min_steps = 4
        n_hw_min = max(1, -(-min_steps // B))             # ceil(min_steps / B)
        cap = max(128, (HW // n_hw_min) // 128 * 128)
        thw = min(thw, cap)
        if thw >= HW:
            thw = HW
    grid = (B, pl.cdiv(HW, thw))

    x_spec = pl.BlockSpec((pl.Squeezed(), C, thw), lambda b, t: (b, 0, t))
    cw_spec = pl.BlockSpec((C, 1), lambda b, t: (0, 0))
    in_specs = [x_spec, cw_spec] + ([cw_spec] if with_bias else [])

    kernel = functools.partial(_ln_bchw_kernel, eps=float(eps),
                               inv_c=1.0 / float(C), with_bias=with_bias)

    out3 = pl.pallas_call(
        kernel,
        out_shape=jax.ShapeDtypeStruct((B, C, HW), x.dtype),
        grid_spec=pltpu.PrefetchScalarGridSpec(
            num_scalar_prefetch=0,
            grid=grid,
            in_specs=in_specs,
            out_specs=x_spec,
        ),
        compiler_params=pltpu.CompilerParams(
            dimension_semantics=("parallel", "parallel"),
            vmem_limit_bytes=vmem_limit_bytes,
        ),
    )(*args)

    return out3.reshape(B, C, H, Wd)


# ----------------------------------------------------------------------------
# Generic last-axis kernel: (rows, C) with C on the minor axis.  g consecutive
# rows are folded into the 128-wide lane axis (lane-dense blocks); per-row
# statistics via small MXU matmuls against in-kernel-generated 0/1 selectors.
# ----------------------------------------------------------------------------
def _ln_rows_kernel(*refs, groups, group_size, eps, with_bias):
    if with_bias:
        x_ref, w_ref, b_ref, o_ref = refs
    else:
        x_ref, w_ref, o_ref = refs
        b_ref = None
    x = x_ref[...].astype(jnp.float32)                    # (T, W)
    w = w_ref[...]                                        # (1, W) f32
    if groups == 1:
        mu = jnp.mean(x, axis=-1, keepdims=True)
        d = x - mu
        var = jnp.mean(d * d, axis=-1, keepdims=True)
        inv_b = jax.lax.rsqrt(var + eps)                  # (T, 1)
    else:
        Wl = groups * group_size
        # 0/1 selection matrices generated in-kernel (no HBM constants, no
        # in-kernel transpose): sd sums lanes->groups, su broadcasts back.
        sd = (jax.lax.broadcasted_iota(jnp.int32, (Wl, groups), 0) // group_size
              == jax.lax.broadcasted_iota(jnp.int32, (Wl, groups), 1)
              ).astype(jnp.float32)                       # (W, g)
        su = (jax.lax.broadcasted_iota(jnp.int32, (groups, Wl), 1) // group_size
              == jax.lax.broadcasted_iota(jnp.int32, (groups, Wl), 0)
              ).astype(jnp.float32)                       # (g, W)
        inv_n = 1.0 / float(group_size)
        mu_g = jnp.dot(x, sd, preferred_element_type=jnp.float32) * inv_n       # (T, g)
        mu_b = jnp.dot(mu_g, su, preferred_element_type=jnp.float32)            # (T, W)
        d = x - mu_b
        var_g = jnp.dot(d * d, sd, preferred_element_type=jnp.float32) * inv_n  # (T, g)
        inv_g = jax.lax.rsqrt(var_g + eps)
        inv_b = jnp.dot(inv_g, su, preferred_element_type=jnp.float32)          # (T, W)
    numer = d if with_bias else x
    y = (numer * inv_b) * w
    if with_bias:
        y = y + b_ref[...]
    o_ref[...] = y.astype(o_ref.dtype)


def _layernorm_rows(x2d, weight, bias, *, with_bias, eps=1e-5,
                    target_block_bytes=2 << 20, vmem_limit_bytes=48 << 20):
    """LayerNorm over the last axis of a 2-D (R, C) array."""
    R, C = x2d.shape
    itemsize = jnp.dtype(x2d.dtype).itemsize

    # Fold g consecutive rows into the 128-lane axis so every load/store is
    # lane-dense.  Pad the row count instead of falling back to <128-lane blocks.
    g = 128 // math.gcd(C, 128)
    Rp = R
    if g > 1 and R % g != 0:
        Rp = ((R + g - 1) // g) * g
        x2d = jnp.pad(x2d, ((0, Rp - R), (0, 0)))
    Wp = g * C
    Rg = Rp // g
    xp = x2d.reshape(Rg, Wp)

    w_f32 = weight.astype(jnp.float32).reshape(1, C)
    wp = jnp.tile(w_f32, (1, g))                          # (1, Wp)
    args = [xp, wp]
    if with_bias:
        b_f32 = (bias if bias is not None else jnp.zeros((C,), jnp.float32))
        bp = jnp.tile(b_f32.astype(jnp.float32).reshape(1, C), (1, g))
        args.append(bp)

    # Row tile: dtype-aware sublane rounding (8 f32 / 16 bf16 / 32 int8 rows),
    # ~target_block_bytes per block, and keep >=4 grid steps when possible.
    pack = 8 * max(1, 4 // itemsize)
    bytes_per_row = Wp * itemsize
    tile = max(pack, (target_block_bytes // bytes_per_row) // pack * pack)
    min_steps = 4
    if Rg // min_steps >= pack:
        tile = min(tile, max(pack, (Rg // min_steps) // pack * pack))
    if tile >= Rg:
        tile = Rg                                         # full extent: always legal
    grid = (pl.cdiv(Rg, tile),)

    kernel = functools.partial(_ln_rows_kernel, groups=g, group_size=C,
                               eps=float(eps), with_bias=with_bias)

    row_spec = pl.BlockSpec((tile, Wp), lambda i: (i, 0))
    vec_spec = pl.BlockSpec((1, Wp), lambda i: (0, 0))
    in_specs = [row_spec, vec_spec] + ([vec_spec] if with_bias else [])

    out = pl.pallas_call(
        kernel,
        out_shape=jax.ShapeDtypeStruct((Rg, Wp), x2d.dtype),
        grid_spec=pltpu.PrefetchScalarGridSpec(
            num_scalar_prefetch=0,
            grid=grid,
            in_specs=in_specs,
            out_specs=row_spec,
        ),
        compiler_params=pltpu.CompilerParams(
            dimension_semantics=("parallel",),
            vmem_limit_bytes=vmem_limit_bytes,
        ),
    )(*args)

    out = out.reshape(Rp, C)
    return out[:R] if Rp != R else out


def withbias_layernorm(x, weight, bias, *, eps=1e-5):
    """WithBias_LayerNorm over the last axis.  x: (..., C)."""
    shape = x.shape
    C = shape[-1]
    y = _layernorm_rows(x.reshape(-1, C), weight, bias, with_bias=True, eps=eps)
    return y.reshape(shape)


def biasfree_layernorm(x, weight, *, eps=1e-5):
    """BiasFree_LayerNorm over the last axis.  x: (..., C)."""
    shape = x.shape
    C = shape[-1]
    y = _layernorm_rows(x.reshape(-1, C), weight, None, with_bias=False, eps=eps)
    return y.reshape(shape)


# ----------------------------------------------------------------------------
# Pure-JAX reference (mirrors the PyTorch module exactly).
# ----------------------------------------------------------------------------
def reference_layernorm_bchw(x, weight, bias=None, *, with_bias=True, eps=1e-5):
    xt = jnp.transpose(x, (0, 2, 3, 1))
    mu = jnp.mean(xt, axis=-1, keepdims=True)
    var = jnp.mean((xt - mu) ** 2, axis=-1, keepdims=True)
    if with_bias:
        y = (xt - mu) / jnp.sqrt(var + eps) * weight + bias
    else:
        y = xt / jnp.sqrt(var + eps) * weight
    return jnp.transpose(y, (0, 3, 1, 2))


if __name__ == "__main__":
    key = jax.random.PRNGKey(0)
    k_x, k_w, k_b, k_x2, k_w2, k_x3 = jax.random.split(key, 6)

    # MaskHDR feeds (B, C, H, W) feature maps into LayerNorm.
    B, C, H, W = 2, 32, 16, 16
    x = jax.random.normal(k_x, (B, C, H, W), dtype=jnp.float32)
    weight = jax.random.normal(k_w, (C,), dtype=jnp.float32)
    bias = jax.random.normal(k_b, (C,), dtype=jnp.float32)

    # WithBias variant (the MaskHDR default).
    out = jax.block_until_ready(layernorm_bchw(x, weight, bias, with_bias=True))
    ref = reference_layernorm_bchw(x, weight, bias, with_bias=True)
    assert out.shape == x.shape
    assert jnp.max(jnp.abs(out - ref)) < 2e-4, "WithBias mismatch vs reference"

    # BiasFree variant.
    out_bf = jax.block_until_ready(layernorm_bchw(x, weight, None, with_bias=False))
    ref_bf = reference_layernorm_bchw(x, weight, None, with_bias=False)
    assert jnp.max(jnp.abs(out_bf - ref_bf)) < 2e-4, "BiasFree mismatch vs reference"

    # Spatial size that is not a multiple of the 128-lane tile (partial block).
    x_p = jax.random.normal(k_x3, (1, C, 12, 20), dtype=jnp.float32)
    out_p = jax.block_until_ready(layernorm_bchw(x_p, weight, bias, with_bias=True))
    ref_p = reference_layernorm_bchw(x_p, weight, bias, with_bias=True)
    assert jnp.max(jnp.abs(out_p - ref_p)) < 2e-4, "partial-block mismatch vs reference"

    # Generic last-axis path with C not dividing 128 (folded lane layout, g=8).
    C2 = 48
    x2 = jax.random.normal(k_x2, (2, 64, C2), dtype=jnp.float32)
    w2 = jax.random.normal(k_w2, (C2,), dtype=jnp.float32)
    b2 = jnp.zeros((C2,), dtype=jnp.float32)
    out2 = jax.block_until_ready(withbias_layernorm(x2, w2, b2))
    mu2 = jnp.mean(x2, axis=-1, keepdims=True)
    var2 = jnp.mean((x2 - mu2) ** 2, axis=-1, keepdims=True)
    ref2 = (x2 - mu2) / jnp.sqrt(var2 + 1e-5) * w2 + b2
    assert jnp.max(jnp.abs(out2 - ref2)) < 2e-4, "C=48 row-path mismatch vs reference"

    print("KERNEL_OK")
</pallas_src>

<mosaic_0001>
module attributes {stable_mosaic.version = 11 : i64} {
  func.func @_ln_bchw_kernel(%arg0: i32, %arg1: i32, %arg2: memref<1x32x128xf32, #tpu.memory_space<vmem>>, %arg3: memref<32x1xf32, #tpu.memory_space<vmem>>, %arg4: memref<32x1xf32, #tpu.memory_space<vmem>>, %arg5: memref<1x32x128xf32, #tpu.memory_space<vmem>>) attributes {dimension_semantics = [#tpu.dimension_semantics<parallel>, #tpu.dimension_semantics<parallel>], iteration_bounds = array<i64: 2, 2>, scalar_prefetch = 0 : i64, scratch_operands = 0 : i64, tpu.core_type = #tpu.core_type<tc>, window_params = [{transform_indices = @transform_0, window_bounds = array<i64: 1, 32, 128>}, {pipeline_mode = #tpu.pipeline_mode<synchronous>, transform_indices = @transform_1, window_bounds = array<i64: 32, 1>}, {pipeline_mode = #tpu.pipeline_mode<synchronous>, transform_indices = @transform_2, window_bounds = array<i64: 32, 1>}, {transform_indices = @transform_3, window_bounds = array<i64: 1, 32, 128>}]} {
    %c0 = arith.constant 0 : index
    %c0_0 = arith.constant 0 : index
    %c0_1 = arith.constant 0 : index
    %0 = vector.load %arg2[%c0, %c0_0, %c0_1] : memref<1x32x128xf32, #tpu.memory_space<vmem>>, vector<1x32x128xf32>
    %1 = vector.shape_cast %0 : vector<1x32x128xf32> to vector<32x128xf32>
    %cst = arith.constant dense<0.000000e+00> : vector<128xf32>
    %2 = vector.multi_reduction <add>, %1, %cst [0] : vector<32x128xf32> to vector<128xf32>
    %3 = vector.shape_cast %2 : vector<128xf32> to vector<1x128xf32>
    %cst_2 = arith.constant 3.125000e-02 : f32
    %4 = vector.broadcast %cst_2 : f32 to vector<1x128xf32>
    %5 = arith.mulf %3, %4 : vector<1x128xf32>
    %6 = vector.broadcast %5 : vector<1x128xf32> to vector<32x128xf32>
    %7 = arith.subf %1, %6 : vector<32x128xf32>
    %8 = arith.mulf %7, %7 : vector<32x128xf32>
    %cst_3 = arith.constant dense<0.000000e+00> : vector<128xf32>
    %9 = vector.multi_reduction <add>, %8, %cst_3 [0] : vector<32x128xf32> to vector<128xf32>
    %10 = vector.shape_cast %9 : vector<128xf32> to vector<1x128xf32>
    %cst_4 = arith.constant 3.125000e-02 : f32
    %11 = vector.broadcast %cst_4 : f32 to vector<1x128xf32>
    %12 = arith.mulf %10, %11 : vector<1x128xf32>
    %cst_5 = arith.constant 9.99999974E-6 : f32
    %13 = vector.broadcast %cst_5 : f32 to vector<1x128xf32>
    %14 = arith.addf %12, %13 : vector<1x128xf32>
    %15 = math.rsqrt %14 : vector<1x128xf32>
    %c0_6 = arith.constant 0 : index
    %c0_7 = arith.constant 0 : index
    %16 = vector.load %arg3[%c0_6, %c0_7] : memref<32x1xf32, #tpu.memory_space<vmem>>, vector<32x1xf32>
    %17 = vector.broadcast %15 : vector<1x128xf32> to vector<32x128xf32>
    %18 = arith.mulf %7, %17 : vector<32x128xf32>
    %19 = vector.broadcast %16 : vector<32x1xf32> to vector<32x128xf32>
    %20 = arith.mulf %18, %19 : vector<32x128xf32>
    %c0_8 = arith.constant 0 : index
    %c0_9 = arith.constant 0 : index
    %21 = vector.load %arg4[%c0_8, %c0_9] : memref<32x1xf32, #tpu.memory_space<vmem>>, vector<32x1xf32>
    %22 = vector.broadcast %21 : vector<32x1xf32> to vector<32x128xf32>
    %23 = arith.addf %20, %22 : vector<32x128xf32>
    %c0_10 = arith.constant 0 : index
    %c0_11 = arith.constant 0 : index
    %c0_12 = arith.constant 0 : index
    %24 = vector.load %arg5[%c0_10, %c0_11, %c0_12] : memref<1x32x128xf32, #tpu.memory_space<vmem>>, vector<1x32x128xf32>
    %25 = vector.shape_cast %24 : vector<1x32x128xf32> to vector<32x128xf32>
    %26 = vector.shape_cast %23 : vector<32x128xf32> to vector<1x32x128xf32>
    tpu.vector_store %arg5[%c0_10, %c0_11, %c0_12], %26 {strides = array<i32>} : memref<1x32x128xf32, #tpu.memory_space<vmem>>, vector<1x32x128xf32>,
    return
  }
  func.func @transform_0(%arg0: i32, %arg1: i32) -> (i32, i32, i32) {
    %c0_i32 = arith.constant 0 : i32
    %c0_i32_0 = arith.constant 0 : i32
    return %arg0, %c0_i32, %arg1 : i32, i32, i32
  }
  func.func @transform_1(%arg0: i32, %arg1: i32) -> (i32, i32) {
    %c0_i32 = arith.constant 0 : i32
    %c0_i32_0 = arith.constant 0 : i32
    %c0_i32_1 = arith.constant 0 : i32
    return %c0_i32, %c0_i32_0 : i32, i32
  }
  func.func @transform_2(%arg0: i32, %arg1: i32) -> (i32, i32) {
    %c0_i32 = arith.constant 0 : i32
    %c0_i32_0 = arith.constant 0 : i32
    %c0_i32_1 = arith.constant 0 : i32
    return %c0_i32, %c0_i32_0 : i32, i32
  }
  func.func @transform_3(%arg0: i32, %arg1: i32) -> (i32, i32, i32) {
    %c0_i32 = arith.constant 0 : i32
    %c0_i32_0 = arith.constant 0 : i32
    return %arg0, %c0_i32, %arg1 : i32, i32, i32
  }
}

</mosaic_0001>

<bundles_post_ra>
// kernel: tpu_custom_call.1
= control target key start
LH: loop header
LB: loop body
LE: loop exit
PB: predicated region body
PF: predicated region fallthrough
CT: control target
= control target key end

     0   :  { %8 = vsyncpa [#allocation3], 0  ;;  %s893_s0 = inlined_call_operand.hbm [shape: f32[2,32,256], index: 0, kind: input, shape index: {}]   ;;  %s894_s1 = inlined_call_operand.vmem [shape: f32[32,1], index: 1, kind: input, shape index: {}]   ;;  %s895_s2 = inlined_call_operand.vmem [shape: f32[32,1], index: 2, kind: input, shape index: {}]   ;;  %s896_s3 = inlined_call_operand.hbm [shape: f32[2,32,256], index: 3, kind: output, shape index: {}]  }
   0x1   :  { %10 = vsyncpa [#allocation3 + $0x1], 0 }
   0x2   :  { %11 = vsyncpa [#allocation4], 0 }
   0x3   :  { %13 = vsyncpa [#allocation4 + $0x1], 0  ;;  %s670_s12 = smov 0   ;;  %s672_s13 = smov 0  }
   0x4   :  { %s674_s14 = smov 0   ;;  %s676_s15 = smov 0  }
   0x5   :  { %s678_s16 = smov 0   ;;  %s680_s17 = smov 0  }
   0x6   :  { %s682_s18 = smov 0   ;;  %s684_s19 = smov 0  }
   0x7 LB: > { %s407_s20 = sadd.s32 4294967295, %s639_s19   ;;  %s408_s21 = sadd.s32 4294967294, %s639_s19   ;;  %s639_s19 = sphi %s684_s19, %s19_s19   ;;  %s635_s18 = sphi %s682_s18, %s914_s18   ;;  %s631_s17 = sphi %s680_s17, %s913_s17   ;;  %s627_s16 = sphi %s678_s16, %s912_s16   ;;  %s623_s15 = sphi %s676_s15, %s911_s15   ;;  %s619_s14 = sphi %s674_s14, %s910_s14   ;;  %s615_s13 = sphi %s672_s13, %s909_s13   ;;  %s611_s12 = sphi %s670_s12, %s908_s12  }
   0x8   : > { %s28_s22 = sadd.s32 1, %s631_s17  ;;  %s31_s23 = sadd.s32 1, %s635_s18 }
   0x9   : > { %p29_p0 = scmp.ge.s32.totalorder %s28_s22, 2  ;;  %s40_s24 = sadd.s32 1, %s619_s14 }
   0xa   : > { %p47_p1 = scmp.ne.s32.totalorder %s619_s14, %s615_s13  ;;  %p48_p2 = scmp.eq.s32.totalorder %s639_s19, 0 }
   0xb   : > { %s916_s22 = smov (%p29_p0, %s28_s22), 0  ;;  %s918_s23 = smov (!%p29_p0, %s31_s23), %s635_s18 }
   0xc   : > { %s36_s25 = ssub.s32 %s631_s17, %s916_s22  ;;  %p723_p3 = por %p48_p2, %p47_p1 }
   0xd   : > { %p33_p4 = scmp.ge.s32.totalorder %s918_s23, 2  ;;  %p53_p5 = scmp.ne.s32.totalorder %s615_s13, %s611_s12 }
   0xe   : > { %p54_p6 = scmp.eq.s32.totalorder %s407_s20, 0  ;;  %p121_p7 = scmp.eq.s32.totalorder %s407_s20, 3 }
   0xf   : > { %s920_s23 = smov (%p33_p4, %s918_s23), 0  ;;  %p127_p10 = scmp.eq.s32.totalorder %s408_s21, 3 }
  0x10   : > { %900 = sst [smem:[#allocation8_spill]] %s920_s23  ;;  %p731_p8 = por %p54_p6, %p53_p5 }
  0x11   : > { %p735_p9 = por %p121_p7, %p47_p1  ;;  %s35_s29 = ssub.s32 %s635_s18, %s920_s23 }
  0x12   : > { %s37_s30 = sor.u32 %s36_s25, %s35_s29  ;;  %p741_p12 = por %p127_p10, %p53_p5 }
  0x13   : > { %s902_s28 = scalar_select %p735_p9, 1, 0 }
  0x14   : > { %p38_p11 = scmp.eq.s32.totalorder %s37_s30, 0  ;;  %p434_p13 = scmp.lt.s32.totalorder %s639_s19, 4 }
  0x15   : > { %s903_s4 = scalar_select %p741_p12, 1, 0 }
  0x16   : > { %s153_s5 = sand.u32 1, %s619_s14   ;;  %s412_s8 = sshll.u32 %s635_s18, 3 }
  0x17   : > { %s748_s6 = scalar_select %p38_p11, %s619_s14, %s40_s24  }
  0x18   : > { %s411_s7 = sshll.u32 %s153_s5, 5  ;;  %s162_s9 = sadd.s32 %s631_s17, %s412_s8 }
  0x19   : > { %s157_s10 = scalar_lea.vmem [#allocation2], %s411_s7  ;;  %s413_s20 = sshll.u32 %s162_s9, 7 }
  0x1a   : > { %s165_s11 = sshll.u32 %s157_s10, 4  ;;  %s757_s25 = scalar_lea.hbm %s893_s0, %s413_s20  ;;  %s752_s11 = int_to_ptr.vmem [resolvable:$true] %s165_s11 }
  0x1b   : > { %p761_p0 = pnand %p434_p13, %p723_p3  ;;  %s765_s29 = scalar_lea.sflag [#allocation3], %s153_s5 }
  0x1c   : > { %s511_s30 = scalar_lea.hbm %s757_s25, 512  ;;  %s516_s7 = scalar_lea.hbm %s893_s0, 2048 }
  0x1d   : > { %p512_p1 = scmp.ne.s32.totalorder %s757_s25, %s511_s30  ;;  %p513_p2 = pneg %p761_p0 }
  0x1e   : > { %p517_p3 = scmp.lt.u32.totalorder %s757_s25, %s893_s0  ;;  %p518_p6 = scmp.lt.u32.totalorder %s516_s7, %s511_s30 }
  0x1f   : > { %p514_p4 = pnand %p513_p2, %p512_p1  ;;  %p520_p10 = scmp.lt.u32.totalorder %s511_s30, %s757_s25 }
  0x20   : > { %p519_p7 = por %p518_p6, %p517_p3 }
  0x21   : > { %p515_p5 = pneg %p514_p4 }
  0x22   : > { %p521_p11 = por %p520_p10, %p519_p7 }
  0x24   : > { %p522_p13 = pnand %p521_p11, %p515_p5 }
  0x26   : > { %525 = shalt.err (!%p522_p13)
}
  0x27   : > { %s526_s5 = scalar_lea.vmem %s752_s11, 512  ;;  %s641_s10 = smov [#allocation2]  }
  0x28   : > { %p527_p1 = scmp.ne.s32.totalorder %s752_s11, %s526_s5  ;;  %s531_s20 = sshll.u32 %s641_s10, 4  ;;  %s532_s20 = int_to_ptr.vmem [resolvable:$false] %s531_s20 }
  0x29   : > { %s533_s21 = scalar_lea.vmem %s532_s20, 1024  ;;  %p534_p9 = scmp.lt.s32.totalorder %s752_s11, %s532_s20 }
  0x2a   : > { %p529_p4 = pnand %p527_p1, %p513_p2  ;;  %p535_p3 = scmp.lt.s32.totalorder %s533_s21, %s526_s5 }
  0x2c   : > { %p530_p12 = pneg %p529_p4  ;;  %p536_p6 = por %p535_p3, %p534_p9 }
  0x2e   : > { %p537_p7 = pnand %p536_p6, %p530_p12 }
  0x30   : > { %540 = shalt.err (!%p537_p7)
}
  0x31   : > { %s642_s30 = smov 256   ;;  %s643_s23 = smov 128  }
  0x32   : > { %s644_s26 = smov 8   ;;  %p414_p2 = scmp.ge.s32.totalorder %s639_s19, 1 }
  0x33   : > { %429 = dma.hbm_to_vmem [thread:$0]  (!%p761_p0), %s757_s25, 512, %s752_s11, %s765_s29, %s642_s30, %s643_s23, %s644_s26  }
  0x34   : > { %p173_p5 = scmp.lt.s32.totalorder %s639_s19, 5 }
  0x36   : > { %p174_p10 = pnand %p414_p2, %p173_p5 }
  0x37   : > { %s796_s7 = sand.u32 (!%p174_p10), 1, %s615_s13  }
  0x38   : > { %177 = sbr.rel (%p174_p10) target bundleno = 224 (0xe0), region = 32  ;;  %s415_s8 = sshll.u32 (!%p174_p10), %s796_s7, 5 }
  0x39   : > { %s180_s9 = scalar_lea.sflag (!%p174_p10), [#allocation3], %s796_s7  ;;  %s183_s5 = scalar_lea.vmem (!%p174_p10), [#allocation2], %s415_s8 }
  0x3f   : > { %602 = dma.done.wait (%p731_p8), %s180_s9, 512  }
  0x40   : > { %604 = vsyncadd (%p731_p8), %s180_s9, 4294966784  ;;  %v645_v0 = vmov 0   ;;  %v242_v1 = vld [vmem:[%s894_s1 + $0x10] sm:$0xff]  ;;  %v240_v2 = vld [vmem:[%s894_s1] sm:$0xff]  ;;  %s205_s20 = scalar_lea.vmem [#allocation5], %s415_s8  ;;  %s305_s30 = scalar_lea.sflag [#allocation4], %s796_s7 }
  0x41   : > { %508 = vset.pattern.permute.xlu1 %v645_v0  ;;  %507 = vset.pattern.permute.xlu0 %v645_v0  ;;  %v243_v3 = vld [vmem:[%s894_s1 + $0x18] sm:$0xff]  ;;  %v241_v4 = vld [vmem:[%s894_s1 + $0x8] sm:$0xff]  ;;  %v272_v6 = vld [vmem:[%s895_s2] sm:$0xff]  ;;  %s319_s21 = sshll.u32 %s205_s20, 4  ;;  %p905_p9 = scmp.ne.s32.totalorder %s902_s28, 0  ;;  %s834_s21 = int_to_ptr.vmem [resolvable:$true] %s319_s21 }
  0x42   : > { %260 = vperm.xlu1 %508, %v242_v1   ;;  %250 = vperm.xlu0 %507, %v240_v2   ;;  %v273_v5 = vld [vmem:[%s895_s2 + $0x8] sm:$0xff]  ;;  %v275_v7 = vld [vmem:[%s895_s2 + $0x18] sm:$0xff]  ;;  %v274_v8 = vld [vmem:[%s895_s2 + $0x10] sm:$0xff]  ;;  %s541_s23 = scalar_lea.vmem %s834_s21, 512  ;;  %s646_s26 = smov [#allocation5]  }
  0x43   : > { %v206_v9 = vld [vmem:[%s183_s5] sm:$0xff]  ;;  %v207_v10 = vld [vmem:[%s183_s5 + $0x8] sm:$0xff]  ;;  %v208_v12 = vld [vmem:[%s183_s5 + $0x10] sm:$0xff]  ;;  %p542_p8 = scmp.ne.s32.totalorder %s834_s21, %s541_s23  ;;  %s545_s9 = sshll.u32 %s646_s26, 4  ;;  %s546_s9 = int_to_ptr.vmem [resolvable:$false] %s545_s9 }
  0x44   : > { %v210_v11 = vadd.f32 %v207_v10, %v206_v9  ;;  %v209_v14 = vld [vmem:[%s183_s5 + $0x18] sm:$0xff]  ;;  %s418_s5 = sshll.u32 %s627_s16, 3  ;;  %s547_s11 = scalar_lea.vmem %s546_s9, 1024 }
  0x45   : > { %s316_s10 = sadd.s32 %s623_s15, %s418_s5  ;;  %p543_p12 = pnand %p542_p8, %p905_p9 }
  0x46   : > { %265 = vperm.xlu1 %508, %v243_v3   ;;  %255 = vperm.xlu0 %507, %v241_v4   ;;  %v211_v13 = vadd.f32 %v210_v11, %v208_v12  ;;  %s419_s27 = sshll.u32 %s316_s10, 7  ;;  %p548_p11 = scmp.lt.s32.totalorder %s834_s21, %s546_s9 }
  0x47   : > { %s839_s8 = scalar_lea.hbm %s896_s3, %s419_s27  ;;  %p544_p0 = pneg %p543_p12 }
  0x48   : > { %v212_v15 = vadd.f32 %v211_v13, %v209_v14  ;;  %p549_p13 = scmp.lt.s32.totalorder %s547_s11, %s541_s23 }
  0x4a   : > { %283 = vperm.xlu1 %508, %v273_v5   ;;  %278 = vperm.xlu0 %507, %v272_v6   ;;  %v213_v16 = vrot.slane %v212_v15, 4  ;;  %p550_p1 = por %p549_p13, %p548_p11 }
  0x4c   : > { %v214_v17 = vadd.f32 %v213_v16, %v212_v15  ;;  %p551_p4 = pnand %p550_p1, %p544_p0 }
  0x4e   : > { %293 = vperm.xlu1 %508, %v275_v7   ;;  %288 = vperm.xlu0 %507, %v274_v8   ;;  %v215_v18 = vrot.slane %v214_v17, 2 }
  0x50   : > { %v216_v19 = vadd.f32 %v215_v18, %v214_v17 }
  0x52   : > { %v217_v20 = vrot.slane %v216_v19, 1 }
  0x54   : > { %v218_v21 = vadd.f32 %v217_v20, %v216_v19 }
  0x56   : > { %v219_v22 = vmul.f32 0.03125, %v218_v21 }
  0x58   : > { %v220_v23 = vsub.f32 %v206_v9, %v219_v22  ;;  %v221_v24 = vsub.f32 %v207_v10, %v219_v22  ;;  %v222_v25 = vsub.f32 %v208_v12, %v219_v22  ;;  %v223_v28 = vsub.f32 %v209_v14, %v219_v22 }
  0x5a   : > { %v224_v26 = vmul.f32 %v220_v23, %v220_v23  ;;  %v225_v27 = vmul.f32 %v221_v24, %v221_v24  ;;  %v226_v29 = vmul.f32 %v222_v25, %v222_v25  ;;  %v227_v31 = vmul.f32 %v223_v28, %v223_v28 }
  0x5c   : > { %v228_v30 = vadd.f32 %v225_v27, %v224_v26 }
  0x5e   : > { %v229_v32 = vadd.f32 %v228_v30, %v226_v29 }
  0x60   : > { %v230_v33 = vadd.f32 %v229_v32, %v227_v31 }
  0x62   : > { %v231_v34 = vrot.slane %v230_v33, 4 }
  0x64   : > { %v232_v35 = vadd.f32 %v231_v34, %v230_v33 }
  0x66   : > { %v233_v36 = vrot.slane %v232_v35, 2 }
  0x68   : > { %v234_v37 = vadd.f32 %v233_v36, %v232_v35 }
  0x6a   : > { %v235_v38 = vrot.slane %v234_v37, 1 }
  0x6c   : > { %v236_v39 = vadd.f32 %v235_v38, %v234_v37 }
  0x6e   : > { %v237_v40 = vmul.f32 0.03125, %v236_v39 }
  0x70   : > { %v238_v41 = vadd.f32 1e-05, %v237_v40 }
  0x72   : > { %509 = vrsqrt.f32 %v238_v41 }
  0x7c   : > { %v510_v42 = vpop.eup %509 }
  0x7d   : > { %v244_v45 = vmul.f32 %v510_v42, %v220_v23  ;;  %v245_v46 = vmul.f32 %v510_v42, %v221_v24  ;;  %v246_v49 = vmul.f32 %v510_v42, %v222_v25  ;;  %v247_v51 = vmul.f32 %v510_v42, %v223_v28 }
  0xc1   : > { %v261_v43 = vpop.permute.xlu1 %260  ;;  %v251_v44 = vpop.permute.xlu0 %250 }
  0xc2   : > { %v268_v50 = vmul.f32 %v251_v44, %v244_v45  ;;  %v270_v57 = vmul.f32 %v261_v43, %v246_v49 }
  0xc5   : > { %v266_v47 = vpop.permute.xlu1 %265  ;;  %v256_v48 = vpop.permute.xlu0 %255 }
  0xc6   : > { %v269_v52 = vmul.f32 %v256_v48, %v245_v46  ;;  %v271_v58 = vmul.f32 %v266_v47, %v247_v51 }
  0xc9   : > { %v284_v53 = vpop.permute.xlu1 %283  ;;  %v279_v54 = vpop.permute.xlu0 %278 }
  0xca   : > { %v297_v55 = vadd.f32 %v284_v53, %v269_v52  ;;  %v296_v56 = vadd.f32 %v279_v54, %v268_v50 }
  0xcc   : > { %301 = vst [vmem:[%s205_s20 + $0x8] sm:$0xff] %v297_v55  ;;  %300 = vst [vmem:[%s205_s20] sm:$0xff] %v296_v56 }
  0xcd   : > { %v294_v59 = vpop.permute.xlu1 %293  ;;  %v289_v60 = vpop.permute.xlu0 %288 }
  0xce   : > { %v299_v61 = vadd.f32 %v294_v59, %v271_v58  ;;  %v298_v62 = vadd.f32 %v289_v60, %v270_v57 }
  0xd0   : > { %303 = vst [vmem:[%s205_s20 + $0x18] sm:$0xff] %v299_v61  ;;  %302 = vst [vmem:[%s205_s20 + $0x10] sm:$0xff] %v298_v62 }
  0xd1   : > { %554 = shalt.err (!%p551_p4)
}
  0xd2   : > { %s555_s25 = scalar_lea.hbm %s839_s8, 512  ;;  %s559_s5 = scalar_lea.hbm %s896_s3, 2048 }
  0xd3   : > { %p556_p3 = scmp.ne.s32.totalorder %s839_s8, %s555_s25  ;;  %p560_p2 = scmp.lt.u32.totalorder %s839_s8, %s896_s3 }
  0xd4   : > { %p561_p5 = scmp.lt.u32.totalorder %s559_s5, %s555_s25  ;;  %p563_p8 = scmp.lt.u32.totalorder %s555_s25, %s839_s8 }
  0xd5   : > { %p557_p6 = pnand %p556_p3, %p905_p9 }
  0xd6   : > { %p562_p10 = por %p561_p5, %p560_p2 }
  0xd7   : > { %p558_p7 = pneg %p557_p6 }
  0xd8   : > { %p564_p12 = por %p563_p8, %p562_p10 }
  0xda   : > { %p565_p0 = pnand %p564_p12, %p558_p7 }
  0xdc   : > { %568 = shalt.err (!%p565_p0)
}
  0xdd   : > { %s647_s27 = smov 128   ;;  %s648_s15 = smov 256  }
  0xde   : > { %s649_s16 = smov 8  }
  0xdf   : > { %424 = dma.vmem_to_hbm [thread:$0]  (%p905_p9), %s834_s21, 512, %s839_s8, %s305_s30, %s647_s27, %s648_s15, %s649_s16  }
  0xe0 PF: > { %p435_p11 = scmp.ge.s32.totalorder %s639_s19, 2  ;;  %s334_s23 = sand.u32 1, %s611_s12  }
  0xe1   : > { %p906_p13 = scmp.ne.s32.totalorder %s903_s4, 0  ;;  %s335_s26 = scalar_lea.sflag [#allocation4], %s334_s23 }
  0xe3   : > { %p431_p1 = pnand %p435_p11, %p906_p13 }
  0xe5   : > { %606 = dma.done.wait (!%p431_p1), %s335_s26, 512  }
  0xe6   : > { %608 = vsyncadd (!%p431_p1), %s335_s26, 4294966784  ;;  %s19_s19 = sadd.s32 1, %s639_s19   ;;  %s907_s28 = sld [smem:[#allocation8_spill]] }
  0xe7   : > { %p16_p4 = scmp.ge.s32.totalorder %s19_s19, 6   ;;  %s908_s12 = smov %s615_s13 }
  0xe8   : > { %s909_s13 = smov %s619_s14  ;;  %s910_s14 = smov %s748_s6 }
  0xe9   : > { %s911_s15 = smov %s631_s17  ;;  %s912_s16 = smov %s635_s18 }
  0xea   : > { %s913_s17 = smov %s916_s22  ;;  %18 = sbr.rel (!%p16_p4) target bundleno = 7 (0x7), region = 77 }
  0xec   : > { %s914_s18 = smov %s907_s28 }
  0xf1   :  { %340 = vsyncpa [#allocation3], 1 }
  0xf2   :  { %342 = vsyncpa [#allocation3 + $0x1], 1 }
  0xf3   :  { %343 = vsyncpa [#allocation4], 1 }
  0xf4   :  { %345 = vsyncpa [#allocation4 + $0x1], 1 }

</bundles_post_ra>
